<compile_context>
chip_gen: v7x
topology: tpu7x:2x2x1
jax: 0.10.0
libtpu: 0.0.40
codegen_flags: <defaults>
</compile_context>

<pallas_src>
import functools

import jax
import jax.numpy as jnp
from jax import lax
from jax.experimental import pallas as pl
from jax.experimental.pallas import tpu as pltpu


def _round_up(x, m):
    return (x + m - 1) // m * m


def _sgm_loss_kernel(diff_ref, feats_ref, out_ref, acc_ref, *, inv_b_sq):
    b = pl.program_id(1)

    @pl.when(b == 0)
    def _init():
        acc_ref[...] = jnp.zeros_like(acc_ref)

    # G_tile += diff^T @ feats, contracting the batch rows (no XLU transpose).
    # Operands share the wrapper-chosen MXU dtype; accumulation stays f32.
    acc_ref[...] += lax.dot_general(
        diff_ref[...], feats_ref[...],
        dimension_numbers=(((0,), (0,)), ((), ())),
        preferred_element_type=jnp.float32)

    @pl.when(b == pl.num_programs(1) - 1)
    def _finalize():
        g = acc_ref[...]                            # (C, td) f32
        partial = jnp.sum(g * g) * inv_b_sq         # 1/B^2 folded in once
        out_ref[...] = jnp.full(out_ref.shape, partial, dtype=out_ref.dtype)


def _tpu_vmem_and_cores():
    """Best-effort hardware query; conservative (v7x-safe) fallback."""
    try:
        info = pltpu.get_tpu_info()
        vmem_bytes = int(getattr(info, "vmem_capacity_bytes", 64 * 2**20))
    except Exception:  # interpret mode / query unavailable
        vmem_bytes = 64 * 2**20
    # v7x exposes 64 MiB VMEM per TensorCore and has 2 TCs/chip; v5e/v6e have
    # 128 MiB and a single TC.  Use VMEM size as the generation heuristic.
    num_tcs = 2 if vmem_bytes <= 64 * 2**20 else 1
    return vmem_bytes, num_tcs


def batch_sgm_loss(feats, scores, classifier_weight, labels, *,
                   tb=None, td=None, mxu_dtype=None, feats_buffers=2):
    """JAX/Pallas equivalent of BatchSGMLoss.forward. classifier_weight unused."""
    del classifier_weight  # unused by the reference forward pass

    B, D = feats.shape
    Bs, C = scores.shape
    assert Bs == B

    # --- Precompute diff = one_hot(labels) - softmax(scores) once (f32 math).
    # This removes the n_d-fold softmax recompute and scores/labels re-stream.
    p = jax.nn.softmax(scores.astype(jnp.float32), axis=1)
    one_hot = (labels.astype(jnp.int32)[:, None]
               == jnp.arange(C, dtype=jnp.int32)[None, :]).astype(jnp.float32)
    diff = one_hot - p                                         # (B, C) f32

    # --- MXU operand dtype.  Default: follow feats (exact f32 path for f32
    # inputs); pass mxu_dtype=jnp.bfloat16 for the bf16 fast path.
    if mxu_dtype is None:
        mxu_dtype = jnp.bfloat16 if feats.dtype == jnp.bfloat16 else jnp.float32
    mxu_dtype = jnp.dtype(mxu_dtype)
    feats = feats.astype(mxu_dtype)
    diff = diff.astype(mxu_dtype)
    feat_bytes = mxu_dtype.itemsize
    diff_bytes = mxu_dtype.itemsize

    # --- Generation-aware VMEM budget & tiling.
    vmem_bytes, num_tcs = _tpu_vmem_and_cores()
    vmem_limit = min(int(vmem_bytes * 3 // 4), 100 * 2**20)    # headroom vs physical
    vmem_limit = max(vmem_limit, 32 * 2**20)
    tile_budget = int(vmem_limit * 0.85)                       # leave compiler slack

    d_pad = _round_up(D, 128)
    if tb is None:
        tb = min(1024, _round_up(B, 8))
    tb = _round_up(tb, 8)

    def _tiles_bytes(tb_, td_):
        return (feats_buffers * tb_ * td_ * feat_bytes         # feats multi-buffer
                + 2 * tb_ * C * diff_bytes                     # diff double-buffer
                + C * td_ * 4)                                 # resident f32 G tile

    if td is None:
        td = d_pad
        # v7x: make sure n_d >= 2 so both TensorCores get D tiles.
        if num_tcs >= 2 and d_pad >= 256:
            td = min(td, _round_up(d_pad // 2, 128))
        # Fit the VMEM budget; prefer shrinking td, fall back to tb.
        while td > 128 and _tiles_bytes(tb, td) > tile_budget:
            td -= 128
        while tb > 8 and _tiles_bytes(tb, td) > tile_budget:
            tb = _round_up(tb // 2, 8)
    td = min(_round_up(td, 128), d_pad)

    b_pad = _round_up(B, tb)
    d_pad = _round_up(D, td)

    # Zero padding keeps the result exact (padded diff rows / feats cols are 0).
    if b_pad != B or d_pad != D:
        feats = jnp.pad(feats, ((0, b_pad - B), (0, d_pad - D)))
    if b_pad != B:
        diff = jnp.pad(diff, ((0, b_pad - B), (0, 0)))

    n_b = b_pad // tb
    n_d = d_pad // td

    kernel = functools.partial(_sgm_loss_kernel, inv_b_sq=1.0 / (B * B))

    cost = pl.CostEstimate(
        flops=int(2 * b_pad * C * d_pad          # G accumulation (MXU)
                  + 2 * n_d * C * td),           # g*g finalize per D tile
        transcendentals=0,                       # softmax lives in the wrapper now
        bytes_accessed=int(b_pad * d_pad * feat_bytes        # feats streamed once
                           + n_d * b_pad * C * diff_bytes    # diff per D pass
                           + n_d * 8 * 128 * 4),             # partial-sum outputs
    )

    feats_spec_kwargs = {}
    if feats_buffers != 2:
        # Deeper pipelining for the small-C / memory-bound regime (sweepable).
        feats_spec_kwargs["pipeline_mode"] = pl.Buffered(feats_buffers)
    feats_spec = pl.BlockSpec((tb, td), lambda d, b: (b, d), **feats_spec_kwargs)

    out = pl.pallas_call(
        kernel,
        out_shape=jax.ShapeDtypeStruct((n_d * 8, 128), jnp.float32),
        grid_spec=pltpu.PrefetchScalarGridSpec(
            num_scalar_prefetch=0,
            grid=(n_d, n_b),                                   # B reduction last
            in_specs=[
                pl.BlockSpec((tb, C), lambda d, b: (b, 0)),    # diff (precomputed)
                feats_spec,                                    # feats
            ],
            out_specs=pl.BlockSpec((8, 128), lambda d, b: (d, 0)),
            scratch_shapes=[pltpu.VMEM((C, td), jnp.float32)],  # resident G tile
        ),
        compiler_params=pltpu.CompilerParams(
            dimension_semantics=("parallel", "arbitrary"),
            vmem_limit_bytes=vmem_limit,
        ),
        cost_estimate=cost,
    )(diff, feats)

    # Each D-tile wrote its partial sum broadcast over one (8, 128) tile.
    partials = out.reshape(n_d, 8, 128)[:, 0, 0]
    return jnp.sum(partials)


def _reference(feats, scores, labels, num_classes):
    one_hot = jax.nn.one_hot(labels, num_classes, dtype=jnp.float32)
    p = jax.nn.softmax(scores.astype(jnp.float32), axis=1)
    G = (one_hot - p).T @ feats.astype(jnp.float32) / feats.shape[0]
    return jnp.sum(G ** 2)


if __name__ == "__main__":
    # Test 1: tiny shapes, single-tile grid, exact f32 path.
    B, C, D = 8, 4, 32
    k1, k2, k3, k4 = jax.random.split(jax.random.PRNGKey(0), 4)
    feats = jax.random.normal(k1, (B, D), jnp.float32)
    scores = jax.random.normal(k2, (B, C), jnp.float32)
    w = jax.random.normal(k3, (C, D), jnp.float32)      # unused
    labels = jax.random.randint(k4, (B,), 0, C, jnp.int32)

    loss = batch_sgm_loss(feats, scores, w, labels)
    jax.block_until_ready(loss)
    ref = _reference(feats, scores, labels, C)
    assert jnp.allclose(loss, ref, rtol=5e-3, atol=1e-3), (loss, ref)

    # Test 2: non-aligned shapes exercising the (D, B) grid + zero padding.
    B, C, D = 60, 10, 200
    k1, k2, k3, k4 = jax.random.split(jax.random.PRNGKey(1), 4)
    feats = jax.random.normal(k1, (B, D), jnp.float32)
    scores = jax.random.normal(k2, (B, C), jnp.float32)
    w = jax.random.normal(k3, (C, D), jnp.float32)      # unused
    labels = jax.random.randint(k4, (B,), 0, C, jnp.int32)

    loss = batch_sgm_loss(feats, scores, w, labels, tb=16, td=128)
    jax.block_until_ready(loss)
    ref = _reference(feats, scores, labels, C)
    assert jnp.allclose(loss, ref, rtol=5e-3, atol=1e-3), (loss, ref)

    # Test 3: bf16 feats fast path (bf16 MXU operands, f32 accumulation).
    feats_bf16 = feats.astype(jnp.bfloat16)
    loss_bf16 = batch_sgm_loss(feats_bf16, scores, w, labels, tb=16, td=128)
    jax.block_until_ready(loss_bf16)
    ref_bf16 = _reference(feats_bf16.astype(jnp.float32), scores, labels, C)
    assert jnp.allclose(loss_bf16, ref_bf16, rtol=5e-2, atol=5e-2), (loss_bf16, ref_bf16)

    # Test 4: explicit bf16-MXU fast path for f32 inputs.
    loss_fast = batch_sgm_loss(feats, scores, w, labels, tb=16, td=128,
                               mxu_dtype=jnp.bfloat16)
    jax.block_until_ready(loss_fast)
    assert jnp.allclose(loss_fast, ref, rtol=5e-2, atol=5e-2), (loss_fast, ref)

    print("KERNEL_OK")
</pallas_src>

<mosaic_0001>
module attributes {stable_mosaic.version = 11 : i64} {
  func.func @_sgm_loss_kernel(%arg0: i32, %arg1: i32, %arg2: memref<8x4xf32, #tpu.memory_space<vmem>>, %arg3: memref<8x128xf32, #tpu.memory_space<vmem>>, %arg4: memref<8x128xf32, #tpu.memory_space<vmem>>, %arg5: memref<4x128xf32, #tpu.memory_space<vmem>>) attributes {dimension_semantics = [#tpu.dimension_semantics<parallel>, #tpu.dimension_semantics<arbitrary>], iteration_bounds = array<i64: 1, 1>, scalar_prefetch = 0 : i64, scratch_operands = 1 : i64, tpu.core_type = #tpu.core_type<tc>, window_params = [{transform_indices = @transform_0, window_bounds = array<i64: 8, 4>}, {transform_indices = @transform_1, window_bounds = array<i64: 8, 128>}, {transform_indices = @transform_2, window_bounds = array<i64: 8, 128>}]} {
    %c0_i32 = arith.constant 0 : i32
    %0 = arith.cmpi eq, %arg1, %c0_i32 : i32
    %1 = arith.extui %0 : i1 to i32
    %c0_i32_0 = arith.constant 0 : i32
    %2 = arith.cmpi ne, %1, %c0_i32_0 : i32
    scf.if %2 {
      %cst_10 = arith.constant 0.000000e+00 : f32
      %12 = vector.broadcast %cst_10 : f32 to vector<4x128xf32>
      %c0_11 = arith.constant 0 : index
      %c0_12 = arith.constant 0 : index
      %13 = vector.load %arg5[%c0_11, %c0_12] : memref<4x128xf32, #tpu.memory_space<vmem>>, vector<4x128xf32>
      tpu.vector_store %arg5[%c0_11, %c0_12], %12 {strides = array<i32>} : memref<4x128xf32, #tpu.memory_space<vmem>>, vector<4x128xf32>,
    } else {
    }
    %c0 = arith.constant 0 : index
    %c0_1 = arith.constant 0 : index
    %3 = vector.load %arg5[%c0, %c0_1] : memref<4x128xf32, #tpu.memory_space<vmem>>, vector<4x128xf32>
    %c0_2 = arith.constant 0 : index
    %c0_3 = arith.constant 0 : index
    %4 = vector.load %arg2[%c0_2, %c0_3] : memref<8x4xf32, #tpu.memory_space<vmem>>, vector<8x4xf32>
    %c0_4 = arith.constant 0 : index
    %c0_5 = arith.constant 0 : index
    %5 = vector.load %arg3[%c0_4, %c0_5] : memref<8x128xf32, #tpu.memory_space<vmem>>, vector<8x128xf32>
    %cst = arith.constant dense<0.000000e+00> : vector<4x128xf32>
    %6 = tpu.matmul %4, %5, %cst {dimension_numbers = #tpu.dot_dimension_numbers<[0], [0], [1], [1], [0, 1, 1, 1], [], []>} : vector<8x4xf32>, vector<8x128xf32>, vector<4x128xf32> -> vector<4x128xf32>
    %7 = arith.addf %3, %6 : vector<4x128xf32>
    %c0_6 = arith.constant 0 : index
    %c0_7 = arith.constant 0 : index
    %8 = vector.load %arg5[%c0_6, %c0_7] : memref<4x128xf32, #tpu.memory_space<vmem>>, vector<4x128xf32>
    tpu.vector_store %arg5[%c0_6, %c0_7], %7 {strides = array<i32>} : memref<4x128xf32, #tpu.memory_space<vmem>>, vector<4x128xf32>,
    %c0_i32_8 = arith.constant 0 : i32
    %9 = arith.cmpi eq, %arg1, %c0_i32_8 : i32
    %10 = arith.extui %9 : i1 to i32
    %c0_i32_9 = arith.constant 0 : i32
    %11 = arith.cmpi ne, %10, %c0_i32_9 : i32
    scf.if %11 {
      %c0_10 = arith.constant 0 : index
      %c0_11 = arith.constant 0 : index
      %12 = vector.load %arg5[%c0_10, %c0_11] : memref<4x128xf32, #tpu.memory_space<vmem>>, vector<4x128xf32>
      %13 = arith.mulf %12, %12 : vector<4x128xf32>
      %14 = vector.shape_cast %13 : vector<4x128xf32> to vector<1x4x128xf32>
      %cst_12 = arith.constant dense<0.000000e+00> : vector<1xf32>
      %15 = vector.multi_reduction <add>, %14, %cst_12 [1, 2] : vector<1x4x128xf32> to vector<1xf32>
      %16 = vector.shape_cast %15 : vector<1xf32> to vector<1x1x1xf32>
      %17 = vector.extract %16[0, 0, 0] : f32 from vector<1x1x1xf32>
      %cst_13 = arith.constant 1.562500e-02 : f32
      %18 = arith.mulf %17, %cst_13 : f32
      %19 = vector.broadcast %18 : f32 to vector<8x128xf32>
      %c0_14 = arith.constant 0 : index
      %c0_15 = arith.constant 0 : index
      %20 = vector.load %arg4[%c0_14, %c0_15] : memref<8x128xf32, #tpu.memory_space<vmem>>, vector<8x128xf32>
      tpu.vector_store %arg4[%c0_14, %c0_15], %19 {strides = array<i32>} : memref<8x128xf32, #tpu.memory_space<vmem>>, vector<8x128xf32>,
    } else {
    }
    return
  }
  func.func @transform_0(%arg0: i32, %arg1: i32) -> (i32, i32) {
    %c0_i32 = arith.constant 0 : i32
    %c0_i32_0 = arith.constant 0 : i32
    return %arg1, %c0_i32 : i32, i32
  }
  func.func @transform_1(%arg0: i32, %arg1: i32) -> (i32, i32) {
    %c0_i32 = arith.constant 0 : i32
    return %arg1, %arg0 : i32, i32
  }
  func.func @transform_2(%arg0: i32, %arg1: i32) -> (i32, i32) {
    %c0_i32 = arith.constant 0 : i32
    %c0_i32_0 = arith.constant 0 : i32
    return %arg0, %c0_i32 : i32, i32
  }
}

</mosaic_0001>

<bundles_post_ra>
// kernel: tpu_custom_call.1
= control target key start
LH: loop header
LB: loop body
LE: loop exit
PB: predicated region body
PF: predicated region fallthrough
CT: control target
= control target key end

     0   :  { %s234_s0 = inlined_call_operand.vmem [shape: f32[8,4], index: 0, kind: input, shape index: {}]   ;;  %s235_s1 = inlined_call_operand.vmem [shape: f32[8,128], index: 1, kind: input, shape index: {}]   ;;  %s236_s2 = inlined_call_operand.hbm [shape: f32[8,128], index: 2, kind: output, shape index: {}]  }
   0x1   :  { %v18_v0 = vld [vmem:[%s234_s0] sm:$0xff] }
   0x2   :  { %v19_v1 = vld [vmem:[%s235_s1] sm:$0xff] }
   0x3   :  { %7 = vsyncpa [#allocation4], 0  ;;  %20 = vxpose.xlu0.b32.start.end [1/1] (short) (narrow) %v18_v0, 8  ;;  %v198_v2 = vmov 0.0   ;;  %vm199_vm0 = vmmov 0   ;;  %vm52_vm1 = vcmask 64512  }
   0x4   :  { %16 = vst [vmem:[#allocation2] sm:$0xf] %v198_v2  ;;  %164 = vmatprep.subr.mxu0 %v198_v2  ;;  %166 = vmatprep.mubr.msk.f32.mxu0 %vm199_vm0, %v198_v2  ;;  %vm133_vm2 = vcmask 1043456   ;;  %s200_s0 = smov [#allocation3]  }
   0x5   :  { %165 = vmatpush3.msra.mxu0 %v19_v1  ;;  %s153_s1 = sshll.u32 %s200_s0, 4  ;;  %s154_s1 = int_to_ptr.vmem [resolvable:$true] %s153_s1 }
   0x6   :  { %s174_s15 = scalar_lea.vmem %s154_s1, 128  ;;  %p179_p1 = scmp.lt.s32.totalorder %s154_s1, %s154_s1 }
   0x7   :  { %p175_p0 = scmp.ne.s32.totalorder %s154_s1, %s174_s15  ;;  %p180_p2 = scmp.lt.s32.totalorder %s174_s15, %s174_s15 }
   0x9   :  { %p181_p3 = por %p180_p2, %p179_p1 }
   0xb   :  { %v17_v4 = vld [vmem:[#allocation2] sm:$0xf]  ;;  %p182_p4 = pnand %p181_p3, %p175_p0 }
  0x83   :  { %v36_v3 = vpop.trf.xlu0 }
  0x84   :  { %167 = vmatmul.mubr.msk.f32.vlgmr.msra.gmra.mrb[0].mxu0 %vm52_vm1, %v36_v3 }
 0x157   :  { %v122_v5 = vpop.f32.mrb[0].mxu0 }
 0x158   :  { %v126_v6 = vadd.f32 %v122_v5, %v17_v4  ;;  %v168_v7 = vpop.f32.mrb[1].mxu0 }
 0x15a   :  { %127 = vst [vmem:[#allocation2] sm:$0xf] %v126_v6 }
 0x161   :  { %v131_v8 = vld [vmem:[#allocation2] sm:$0xf] }
 0x162   :  { %v132_v9 = vmul.f32 %v131_v8, %v131_v8 }
 0x164   :  { %v134_v10 = vsel %vm133_vm2, %v132_v9, 0.0 }
 0x165   :  { %135 = vadd.xlane.f32.xlu0 %v134_v10 }
 0x1f2   :  { %v136_v11 = vpop.xlane.xlu0 %135 }
 0x1f3   :  { %v137_v12 = vrot.slane %v136_v11, 4 }
 0x1f5   :  { %v138_v13 = vadd.f32 %v137_v12, %v136_v11 }
 0x1f7   :  { %v139_v14 = vrot.slane %v138_v13, 2 }
 0x1f9   :  { %v140_v15 = vadd.f32 %v139_v14, %v138_v13 }
 0x1fb   :  { %v141_v16 = vrot.slane %v140_v15, 1 }
 0x1fd   :  { %v142_v17 = vadd.f32 %v141_v16, %v140_v15 }
 0x1ff   :  { %169 = vpush %v142_v17 }
 0x230   :  { %s170_s13 = spop %169 }
 0x231   :  { %s144_s14 = smul.f32 0.015625, %s170_s13 }
 0x233   :  { %v145_v18 = vstv %s144_s14 }
 0x234   :  { %146 = vst [vmem:[#allocation3] sm:$0xff] %v145_v18 }
 0x235   :  { %185 = shalt.err (!%p182_p4)
}
 0x236   :  { %s186_s18 = scalar_lea.hbm %s236_s2, 128 }
 0x237   :  { %p187_p5 = scmp.ne.s32.totalorder %s236_s2, %s186_s18  ;;  %p190_p6 = scmp.lt.u32.totalorder %s186_s18, %s236_s2 }
 0x239   :  { %p192_p7 = pnand %p190_p6, %p187_p5 }
 0x23b   :  { %195 = shalt.err (!%p192_p7)
}
 0x23c   :  { %156 = dma.vmem_to_hbm [thread:$0]  %s154_s1, 128, %s236_s2, [#allocation4]  }
 0x23d   :  { %196 = dma.done.wait [#allocation4], 128  }
 0x23e   :  { %197 = vsyncadd [#allocation4], 4294967168 }
 0x23f   :  { %160 = vsyncpa [#allocation4], 1 }

</bundles_post_ra>
